<compile_context>
chip_gen: v7x
topology: tpu7x:2x2x1
jax: 0.10.0
libtpu: 0.0.40
codegen_flags: <defaults>
</compile_context>

<pallas_src>
import functools

import jax
import jax.numpy as jnp
from jax.experimental import pallas as pl
from jax.experimental.pallas import tpu as pltpu

# ----------------------------- config ---------------------------------------
B, C, H, W = 2, 4, 16, 16          # small shapes consistent with NCHW images
NUM_NOISE_VEC = 4                  # module default is 40; small value here
NUM_CLASSES = 10
NC_PAD = 128                       # lane-dense class padding
NEG_INF = -1e30                    # bias for padded classes -> softmax prob 0
NOISE_SD = 0.25
DIFFUSION_STEPS = 1000


# ----------------------- diffusion schedule (init-time) ---------------------
def make_schedule(steps):
    # guided-diffusion "linear" beta schedule
    scale = 1000.0 / steps
    betas = jnp.linspace(scale * 0.0001, scale * 0.02, steps, dtype=jnp.float32)
    alphas_cumprod = jnp.cumprod(1.0 - betas)
    sqrt_ac = jnp.sqrt(alphas_cumprod)
    sqrt_1mac = jnp.sqrt(1.0 - alphas_cumprod)
    sqrt_recip_ac = jnp.sqrt(1.0 / alphas_cumprod)
    sqrt_recipm1_ac = jnp.sqrt(1.0 / alphas_cumprod - 1.0)
    return sqrt_ac, sqrt_1mac, sqrt_recip_ac, sqrt_recipm1_ac


def find_t(noise_sd, sqrt_ac, sqrt_1mac):
    # replicates the while-loop in DiffusionRobustModel.__init__
    real_sigma, t = 0.0, 0
    while real_sigma < noise_sd * 2:
        t += 1
        real_sigma = float(sqrt_1mac[t]) / float(sqrt_ac[t])
    return t


# ----------------------------- Pallas kernel --------------------------------
def _fused_forward_kernel(x_ref, noise_ref, wc_ref, bc_ref, out_ref, *,
                          two_a, b, w_eff, b_eff, nv):
    """q_sample + eps-model + pred_xstart + classifier + softmax + mean(nv).

    One grid step handles one image and ALL its noise-vector replicas.
      x_ref     : (C, HW)        image, pixels in lanes
      noise_ref : (C, nv, HW)    standard-normal q_sample noise
      wc_ref    : (C, HW, NC_PAD) classifier weight (0.5 folded in, 0-padded)
      bc_ref    : (1, NC_PAD)    effective classifier bias (-1e30 on padding)
      out_ref   : (8, NC_PAD)    per-image mean probability (row 0 consumed)
    w_eff / b_eff / two_a / b are compile-time Python floats (wrapper fusion of
    the 2x-1 shift, q_sample scaling, eps model and sr/srm1 pred_xstart).
    """
    c, hw = x_ref.shape
    nc = out_ref.shape[-1]

    # u[i] = 2a*x[i] + b*noise[i]  (the "-a" shift is folded into b_eff)
    u = [two_a * x_ref[i:i + 1, :] + b * noise_ref[i] for i in range(c)]   # (nv, HW)

    # classifier logits, batched over the nv replicas (M = nv per MXU dot)
    logits = jnp.broadcast_to(bc_ref[...], (nv, nc))                       # (nv, NC_PAD)
    for o in range(c):                                                     # static unroll
        # pred_xstart channel o on the VPU: clip(W_eff[o,:].u + b_eff[o], -1, 1)
        acc = b_eff[o] + w_eff[o][0] * u[0]
        for i in range(1, c):
            acc = acc + w_eff[o][i] * u[i]
        pred_o = jnp.clip(acc, -1.0, 1.0)                                  # (nv, HW)
        logits = logits + jnp.dot(pred_o, wc_ref[o],
                                  preferred_element_type=jnp.float32)

    # softmax over padded classes (padded bias = -1e30 -> exactly 0 probability);
    # exact divide: the denominator is a single scalar per row.
    m = jnp.max(logits, axis=1, keepdims=True)
    e = jnp.exp(logits - m)
    p = e / jnp.sum(e, axis=1, keepdims=True)

    mean_p = jnp.mean(p, axis=0, keepdims=True)                            # (1, NC_PAD)
    # single lane-dense unmasked store; only sublane 0 is consumed by the wrapper
    out_ref[...] = jnp.broadcast_to(mean_p, out_ref.shape)


# ------------------------------- wrapper -------------------------------------
def diffusion_robust_forward(x_nchw, params, noise):
    """Forward pass of DiffusionRobustModel (diffusion branch), fully fused.

    `noise` has shape (N, C, num_noise_vec, H*W); the same array is consumed by
    the pure-JAX reference so the check is bit-exact.
    NOTE: this wrapper concretizes the small eps-model weights into Python
    floats (wrapper-time weight fusion), so it must not itself be jit-traced.
    """
    n_img, c, h, w = x_nchw.shape
    hw = h * w
    nv = noise.shape[2]
    assert noise.shape == (n_img, c, nv, hw)

    a, b, sr, srm1 = params["a"], params["b"], params["sr"], params["srm1"]

    # pixels-in-lanes layout: pure reshape, no transpose
    x3 = x_nchw.reshape(n_img, c, hw)

    # --- wrapper-time affine / weight fusion (eps model + pred_xstart) --------
    # TODO(synk): the real guided-diffusion UNet (and its timestep embedding) is
    # a checkpointed network; stood in by a deterministic per-pixel linear model.
    wm_eps = params["wm"][:, :c]                                     # (C_in, C_out)
    w_eff = sr * jnp.eye(c, dtype=jnp.float32) - srm1 * wm_eps.T     # (C_out, C_in)
    b_eff = -srm1 * params["bm"][0, :c] - a * jnp.sum(w_eff, axis=1)
    w_eff_t = tuple(tuple(float(v) for v in row) for row in w_eff.tolist())
    b_eff_t = tuple(float(v) for v in b_eff.tolist())

    # classifier weights with the (pred+1)*0.5 folded in; classes padded to 128;
    # padded classes get a -1e30 bias so softmax assigns them exactly 0.
    wc3 = 0.5 * params["wc"].reshape(c, hw, NUM_CLASSES)
    wc_pad = jnp.zeros((c, hw, NC_PAD), jnp.float32).at[:, :, :NUM_CLASSES].set(wc3)
    bc_eff = params["bc"] + 0.5 * jnp.sum(params["wc"], axis=0, keepdims=True)
    bc_pad = jnp.full((1, NC_PAD), NEG_INF, jnp.float32).at[:, :NUM_CLASSES].set(bc_eff)

    kern = functools.partial(_fused_forward_kernel, two_a=2.0 * a, b=b,
                             w_eff=w_eff_t, b_eff=b_eff_t, nv=nv)

    out_pad = pl.pallas_call(
        kern,
        out_shape=jax.ShapeDtypeStruct((n_img, 8, NC_PAD), jnp.float32),
        grid=(n_img,),                                 # one step per image
        in_specs=[
            pl.BlockSpec((None, c, hw), lambda i: (i, 0, 0)),
            pl.BlockSpec((None, c, nv, hw), lambda i: (i, 0, 0, 0)),
            # weights: constant index_map -> stay resident in VMEM
            pl.BlockSpec((c, hw, NC_PAD), lambda i: (0, 0, 0)),
            pl.BlockSpec((1, NC_PAD), lambda i: (0, 0)),
        ],
        out_specs=pl.BlockSpec((None, 8, NC_PAD), lambda i: (i, 0, 0)),
        compiler_params=pltpu.CompilerParams(
            dimension_semantics=("parallel",),         # v7x: images across TCs
            vmem_limit_bytes=4 * 1024 * 1024),         # ~1 MiB actually used
    )(x3, noise, wc_pad, bc_pad)

    per_image = out_pad[:, 0, :NUM_CLASSES]             # (N, NC): mean over noise vecs
    return jnp.mean(per_image, axis=0, keepdims=True)   # (1, NC): mean over all replicas


# ---------------------------- pure-JAX reference ------------------------------
def reference_forward(x_nchw, params, noise):
    """Pure-JAX forward consuming the exact same q_sample noise as the kernel."""
    n_img, c, h, w = x_nchw.shape
    hw = h * w
    nv = noise.shape[2]
    a, b, sr, srm1 = params["a"], params["b"], params["sr"], params["srm1"]

    x3 = x_nchw.reshape(n_img, c, hw)
    xs = x3 * 2.0 - 1.0
    xt = a * xs[:, :, None, :] + b * noise                           # (N, C, nv, HW)
    wm_eps = params["wm"][:, :c]                                     # (C_in, C_out)
    bm_eps = params["bm"][0, :c]
    eps = jnp.einsum("nivp,io->novp", xt, wm_eps) + bm_eps[None, :, None, None]
    pred = jnp.clip(sr * xt - srm1 * eps, -1.0, 1.0)
    x_den = (pred + 1.0) * 0.5                                       # (N, C, nv, HW)
    wc3 = params["wc"].reshape(c, hw, NUM_CLASSES)
    logits = jnp.einsum("ncvp,cpk->nvk", x_den, wc3) + params["bc"]
    p = jax.nn.softmax(logits, axis=-1)
    return jnp.mean(p.reshape(n_img * nv, -1), axis=0, keepdims=True)


# --------------------------------- main ---------------------------------------
if __name__ == "__main__":
    sqrt_ac, sqrt_1mac, sqrt_recip_ac, sqrt_recipm1_ac = make_schedule(DIFFUSION_STEPS)
    t = find_t(NOISE_SD, sqrt_ac, sqrt_1mac)
    print("t found for sigma %.2f: %d" % (NOISE_SD, t))

    key = jax.random.PRNGKey(0)
    k_x, k_wm, k_bm, k_wc, k_bc, k_noise = jax.random.split(key, 6)

    # deterministic synthetic parameters (no checkpoint loading)
    # TODO(synk): the external classifier is a checkpointed network; stood in by
    # a deterministic linear classifier over the flattened denoised image.
    d = C * H * W
    params = {
        "wm": 0.1 * jax.random.normal(k_wm, (C, 2 * C), dtype=jnp.float32),
        "bm": 0.01 * jax.random.normal(k_bm, (1, 2 * C), dtype=jnp.float32),
        "wc": 0.05 * jax.random.normal(k_wc, (d, NUM_CLASSES), dtype=jnp.float32),
        "bc": 0.01 * jax.random.normal(k_bc, (1, NUM_CLASSES), dtype=jnp.float32),
        "a": float(sqrt_ac[t]),
        "b": float(sqrt_1mac[t]),
        "sr": float(sqrt_recip_ac[t]),
        "srm1": float(sqrt_recipm1_ac[t]),
    }

    # input image batch in [0, 1], NCHW as in PyTorch
    x = jax.random.uniform(k_x, (B, C, H, W), dtype=jnp.float32)

    # q_sample noise drawn host-side (torch.randn_like equivalent); shared
    # bit-exactly between the Pallas kernel and the pure-JAX reference.
    noise = jax.random.normal(k_noise, (B, C, NUM_NOISE_VEC, H * W),
                              dtype=jnp.float32)

    out = jax.block_until_ready(diffusion_robust_forward(x, params, noise))
    ref = jax.block_until_ready(reference_forward(x, params, noise))

    assert out.shape == (1, NUM_CLASSES)
    assert jnp.allclose(out, ref, rtol=1e-2, atol=1e-3), (out, ref)
    assert jnp.isclose(jnp.sum(out), 1.0, atol=1e-3)

    print("KERNEL_OK")
</pallas_src>

<mosaic_0001>
module attributes {stable_mosaic.version = 11 : i64} {
  func.func @_fused_forward_kernel(%arg0: i32, %arg1: memref<1x4x256xf32, #tpu.memory_space<vmem>>, %arg2: memref<1x4x4x256xf32, #tpu.memory_space<vmem>>, %arg3: memref<4x256x128xf32, #tpu.memory_space<vmem>>, %arg4: memref<1x128xf32, #tpu.memory_space<vmem>>, %arg5: memref<1x8x128xf32, #tpu.memory_space<vmem>>) attributes {dimension_semantics = [#tpu.dimension_semantics<parallel>], iteration_bounds = array<i64: 2>, scalar_prefetch = 0 : i64, scratch_operands = 0 : i64, tpu.core_type = #tpu.core_type<tc>, window_params = [{transform_indices = @transform_0, window_bounds = array<i64: 1, 4, 256>}, {transform_indices = @transform_1, window_bounds = array<i64: 1, 4, 4, 256>}, {pipeline_mode = #tpu.pipeline_mode<synchronous>, transform_indices = @transform_2, window_bounds = array<i64: 4, 256, 128>}, {pipeline_mode = #tpu.pipeline_mode<synchronous>, transform_indices = @transform_3, window_bounds = array<i64: 1, 128>}, {transform_indices = @transform_4, window_bounds = array<i64: 1, 8, 128>}]} {
    %c0 = arith.constant 0 : index
    %c0_0 = arith.constant 0 : index
    %c0_1 = arith.constant 0 : index
    %0 = vector.load %arg1[%c0, %c0_0, %c0_1] : memref<1x4x256xf32, #tpu.memory_space<vmem>>, vector<1x1x256xf32>
    %1 = vector.shape_cast %0 : vector<1x1x256xf32> to vector<1x256xf32>
    %cst = arith.constant 1.78658879 : f32
    %2 = vector.broadcast %cst : f32 to vector<1x256xf32>
    %3 = arith.mulf %2, %1 : vector<1x256xf32>
    %c0_2 = arith.constant 0 : index
    %c0_3 = arith.constant 0 : index
    %c0_4 = arith.constant 0 : index
    %c0_5 = arith.constant 0 : index
    %4 = vector.load %arg2[%c0_2, %c0_3, %c0_4, %c0_5] : memref<1x4x4x256xf32, #tpu.memory_space<vmem>>, vector<1x1x4x256xf32>
    %5 = vector.shape_cast %4 : vector<1x1x4x256xf32> to vector<4x256xf32>
    %cst_6 = arith.constant 0.44947204 : f32
    %6 = vector.broadcast %cst_6 : f32 to vector<4x256xf32>
    %7 = arith.mulf %6, %5 : vector<4x256xf32>
    %8 = vector.broadcast %3 : vector<1x256xf32> to vector<4x256xf32>
    %9 = arith.addf %8, %7 : vector<4x256xf32>
    %c0_7 = arith.constant 0 : index
    %c1 = arith.constant 1 : index
    %c0_8 = arith.constant 0 : index
    %10 = vector.load %arg1[%c0_7, %c1, %c0_8] : memref<1x4x256xf32, #tpu.memory_space<vmem>>, vector<1x1x256xf32>
    %11 = vector.shape_cast %10 : vector<1x1x256xf32> to vector<1x256xf32>
    %cst_9 = arith.constant 1.78658879 : f32
    %12 = vector.broadcast %cst_9 : f32 to vector<1x256xf32>
    %13 = arith.mulf %12, %11 : vector<1x256xf32>
    %c0_10 = arith.constant 0 : index
    %c1_11 = arith.constant 1 : index
    %c0_12 = arith.constant 0 : index
    %c0_13 = arith.constant 0 : index
    %14 = vector.load %arg2[%c0_10, %c1_11, %c0_12, %c0_13] : memref<1x4x4x256xf32, #tpu.memory_space<vmem>>, vector<1x1x4x256xf32>
    %15 = vector.shape_cast %14 : vector<1x1x4x256xf32> to vector<4x256xf32>
    %cst_14 = arith.constant 0.44947204 : f32
    %16 = vector.broadcast %cst_14 : f32 to vector<4x256xf32>
    %17 = arith.mulf %16, %15 : vector<4x256xf32>
    %18 = vector.broadcast %13 : vector<1x256xf32> to vector<4x256xf32>
    %19 = arith.addf %18, %17 : vector<4x256xf32>
    %c0_15 = arith.constant 0 : index
    %c2 = arith.constant 2 : index
    %c0_16 = arith.constant 0 : index
    %20 = vector.load %arg1[%c0_15, %c2, %c0_16] : memref<1x4x256xf32, #tpu.memory_space<vmem>>, vector<1x1x256xf32>
    %21 = vector.shape_cast %20 : vector<1x1x256xf32> to vector<1x256xf32>
    %cst_17 = arith.constant 1.78658879 : f32
    %22 = vector.broadcast %cst_17 : f32 to vector<1x256xf32>
    %23 = arith.mulf %22, %21 : vector<1x256xf32>
    %c0_18 = arith.constant 0 : index
    %c2_19 = arith.constant 2 : index
    %c0_20 = arith.constant 0 : index
    %c0_21 = arith.constant 0 : index
    %24 = vector.load %arg2[%c0_18, %c2_19, %c0_20, %c0_21] : memref<1x4x4x256xf32, #tpu.memory_space<vmem>>, vector<1x1x4x256xf32>
    %25 = vector.shape_cast %24 : vector<1x1x4x256xf32> to vector<4x256xf32>
    %cst_22 = arith.constant 0.44947204 : f32
    %26 = vector.broadcast %cst_22 : f32 to vector<4x256xf32>
    %27 = arith.mulf %26, %25 : vector<4x256xf32>
    %28 = vector.broadcast %23 : vector<1x256xf32> to vector<4x256xf32>
    %29 = arith.addf %28, %27 : vector<4x256xf32>
    %c0_23 = arith.constant 0 : index
    %c3 = arith.constant 3 : index
    %c0_24 = arith.constant 0 : index
    %30 = vector.load %arg1[%c0_23, %c3, %c0_24] : memref<1x4x256xf32, #tpu.memory_space<vmem>>, vector<1x1x256xf32>
    %31 = vector.shape_cast %30 : vector<1x1x256xf32> to vector<1x256xf32>
    %cst_25 = arith.constant 1.78658879 : f32
    %32 = vector.broadcast %cst_25 : f32 to vector<1x256xf32>
    %33 = arith.mulf %32, %31 : vector<1x256xf32>
    %c0_26 = arith.constant 0 : index
    %c3_27 = arith.constant 3 : index
    %c0_28 = arith.constant 0 : index
    %c0_29 = arith.constant 0 : index
    %34 = vector.load %arg2[%c0_26, %c3_27, %c0_28, %c0_29] : memref<1x4x4x256xf32, #tpu.memory_space<vmem>>, vector<1x1x4x256xf32>
    %35 = vector.shape_cast %34 : vector<1x1x4x256xf32> to vector<4x256xf32>
    %cst_30 = arith.constant 0.44947204 : f32
    %36 = vector.broadcast %cst_30 : f32 to vector<4x256xf32>
    %37 = arith.mulf %36, %35 : vector<4x256xf32>
    %38 = vector.broadcast %33 : vector<1x256xf32> to vector<4x256xf32>
    %39 = arith.addf %38, %37 : vector<4x256xf32>
    %c0_31 = arith.constant 0 : index
    %c0_32 = arith.constant 0 : index
    %40 = vector.load %arg4[%c0_31, %c0_32] : memref<1x128xf32, #tpu.memory_space<vmem>>, vector<1x128xf32>
    %41 = vector.shape_cast %40 : vector<1x128xf32> to vector<1x128xf32>
    %42 = vector.broadcast %41 : vector<1x128xf32> to vector<4x128xf32>
    %cst_33 = arith.constant 1.24234688 : f32
    %43 = vector.broadcast %cst_33 : f32 to vector<4x256xf32>
    %44 = arith.mulf %43, %9 : vector<4x256xf32>
    %cst_34 = arith.constant -1.28079212 : f32
    %45 = vector.broadcast %cst_34 : f32 to vector<4x256xf32>
    %46 = arith.addf %45, %44 : vector<4x256xf32>
    %cst_35 = arith.constant 0.065941222 : f32
    %47 = vector.broadcast %cst_35 : f32 to vector<4x256xf32>
    %48 = arith.mulf %47, %19 : vector<4x256xf32>
    %49 = arith.addf %46, %48 : vector<4x256xf32>
    %cst_36 = arith.constant 0.0598913804 : f32
    %50 = vector.broadcast %cst_36 : f32 to vector<4x256xf32>
    %51 = arith.mulf %50, %29 : vector<4x256xf32>
    %52 = arith.addf %49, %51 : vector<4x256xf32>
    %cst_37 = arith.constant 0.058307644 : f32
    %53 = vector.broadcast %cst_37 : f32 to vector<4x256xf32>
    %54 = arith.mulf %53, %39 : vector<4x256xf32>
    %55 = arith.addf %52, %54 : vector<4x256xf32>
    %cst_38 = arith.constant -1.000000e+00 : f32
    %cst_39 = arith.constant 1.000000e+00 : f32
    %56 = vector.broadcast %cst_38 : f32 to vector<4x256xf32>
    %57 = arith.maximumf %56, %55 : vector<4x256xf32>
    %58 = vector.broadcast %cst_39 : f32 to vector<4x256xf32>
    %59 = arith.minimumf %58, %57 : vector<4x256xf32>
    %c0_40 = arith.constant 0 : index
    %c0_41 = arith.constant 0 : index
    %c0_42 = arith.constant 0 : index
    %60 = vector.load %arg3[%c0_40, %c0_41, %c0_42] : memref<4x256x128xf32, #tpu.memory_space<vmem>>, vector<1x256x128xf32>
    %61 = vector.shape_cast %60 : vector<1x256x128xf32> to vector<256x128xf32>
    %cst_43 = arith.constant dense<0.000000e+00> : vector<4x128xf32>
    %62 = tpu.matmul %59, %61, %cst_43 {dimension_numbers = #tpu.dot_dimension_numbers<[1], [0], [0], [1], [0, 0, 1, 1], [], []>} : vector<4x256xf32>, vector<256x128xf32>, vector<4x128xf32> -> vector<4x128xf32>
    %63 = arith.addf %42, %62 : vector<4x128xf32>
    %cst_44 = arith.constant 0.102427766 : f32
    %64 = vector.broadcast %cst_44 : f32 to vector<4x256xf32>
    %65 = arith.mulf %64, %9 : vector<4x256xf32>
    %cst_45 = arith.constant -1.03009951 : f32
    %66 = vector.broadcast %cst_45 : f32 to vector<4x256xf32>
    %67 = arith.addf %66, %65 : vector<4x256xf32>
    %cst_46 = arith.constant 1.01226807 : f32
    %68 = vector.broadcast %cst_46 : f32 to vector<4x256xf32>
    %69 = arith.mulf %68, %19 : vector<4x256xf32>
    %70 = arith.addf %67, %69 : vector<4x256xf32>
    %cst_47 = arith.constant 0.00348468241 : f32
    %71 = vector.broadcast %cst_47 : f32 to vector<4x256xf32>
    %72 = arith.mulf %71, %29 : vector<4x256xf32>
    %73 = arith.addf %70, %72 : vector<4x256xf32>
    %cst_48 = arith.constant 0.0273338538 : f32
    %74 = vector.broadcast %cst_48 : f32 to vector<4x256xf32>
    %75 = arith.mulf %74, %39 : vector<4x256xf32>
    %76 = arith.addf %73, %75 : vector<4x256xf32>
    %cst_49 = arith.constant -1.000000e+00 : f32
    %cst_50 = arith.constant 1.000000e+00 : f32
    %77 = vector.broadcast %cst_49 : f32 to vector<4x256xf32>
    %78 = arith.maximumf %77, %76 : vector<4x256xf32>
    %79 = vector.broadcast %cst_50 : f32 to vector<4x256xf32>
    %80 = arith.minimumf %79, %78 : vector<4x256xf32>
    %c1_51 = arith.constant 1 : index
    %c0_52 = arith.constant 0 : index
    %c0_53 = arith.constant 0 : index
    %81 = vector.load %arg3[%c1_51, %c0_52, %c0_53] : memref<4x256x128xf32, #tpu.memory_space<vmem>>, vector<1x256x128xf32>
    %82 = vector.shape_cast %81 : vector<1x256x128xf32> to vector<256x128xf32>
    %cst_54 = arith.constant dense<0.000000e+00> : vector<4x128xf32>
    %83 = tpu.matmul %80, %82, %cst_54 {dimension_numbers = #tpu.dot_dimension_numbers<[1], [0], [0], [1], [0, 0, 1, 1], [], []>} : vector<4x256xf32>, vector<256x128xf32>, vector<4x128xf32> -> vector<4x128xf32>
    %84 = arith.addf %63, %83 : vector<4x128xf32>
    %cst_55 = arith.constant -0.0103422105 : f32
    %85 = vector.broadcast %cst_55 : f32 to vector<4x256xf32>
    %86 = arith.mulf %85, %9 : vector<4x256xf32>
    %cst_56 = arith.constant -1.00388348 : f32
    %87 = vector.broadcast %cst_56 : f32 to vector<4x256xf32>
    %88 = arith.addf %87, %86 : vector<4x256xf32>
    %cst_57 = arith.constant 0.00953856483 : f32
    %89 = vector.broadcast %cst_57 : f32 to vector<4x256xf32>
    %90 = arith.mulf %89, %19 : vector<4x256xf32>
    %91 = arith.addf %88, %90 : vector<4x256xf32>
    %cst_58 = arith.constant 1.167557 : f32
    %92 = vector.broadcast %cst_58 : f32 to vector<4x256xf32>
    %93 = arith.mulf %92, %29 : vector<4x256xf32>
    %94 = arith.addf %91, %93 : vector<4x256xf32>
    %cst_59 = arith.constant -0.0406469777 : f32
    %95 = vector.broadcast %cst_59 : f32 to vector<4x256xf32>
    %96 = arith.mulf %95, %39 : vector<4x256xf32>
    %97 = arith.addf %94, %96 : vector<4x256xf32>
    %cst_60 = arith.constant -1.000000e+00 : f32
    %cst_61 = arith.constant 1.000000e+00 : f32
    %98 = vector.broadcast %cst_60 : f32 to vector<4x256xf32>
    %99 = arith.maximumf %98, %97 : vector<4x256xf32>
    %100 = vector.broadcast %cst_61 : f32 to vector<4x256xf32>
    %101 = arith.minimumf %100, %99 : vector<4x256xf32>
    %c2_62 = arith.constant 2 : index
    %c0_63 = arith.constant 0 : index
    %c0_64 = arith.constant 0 : index
    %102 = vector.load %arg3[%c2_62, %c0_63, %c0_64] : memref<4x256x128xf32, #tpu.memory_space<vmem>>, vector<1x256x128xf32>
    %103 = vector.shape_cast %102 : vector<1x256x128xf32> to vector<256x128xf32>
    %cst_65 = arith.constant dense<0.000000e+00> : vector<4x128xf32>
    %104 = tpu.matmul %101, %103, %cst_65 {dimension_numbers = #tpu.dot_dimension_numbers<[1], [0], [0], [1], [0, 0, 1, 1], [], []>} : vector<4x256xf32>, vector<256x128xf32>, vector<4x128xf32> -> vector<4x128xf32>
    %105 = arith.addf %84, %104 : vector<4x128xf32>
    %cst_66 = arith.constant 0.0177893117 : f32
    %106 = vector.broadcast %cst_66 : f32 to vector<4x256xf32>
    %107 = arith.mulf %106, %9 : vector<4x256xf32>
    %cst_67 = arith.constant -0.98234862 : f32
    %108 = vector.broadcast %cst_67 : f32 to vector<4x256xf32>
    %109 = arith.addf %108, %107 : vector<4x256xf32>
    %cst_68 = arith.constant -0.0485054553 : f32
    %110 = vector.broadcast %cst_68 : f32 to vector<4x256xf32>
    %111 = arith.mulf %110, %19 : vector<4x256xf32>
    %112 = arith.addf %109, %111 : vector<4x256xf32>
    %cst_69 = arith.constant 0.0985576063 : f32
    %113 = vector.broadcast %cst_69 : f32 to vector<4x256xf32>
    %114 = arith.mulf %113, %29 : vector<4x256xf32>
    %115 = arith.addf %112, %114 : vector<4x256xf32>
    %cst_70 = arith.constant 1.03619826 : f32
    %116 = vector.broadcast %cst_70 : f32 to vector<4x256xf32>
    %117 = arith.mulf %116, %39 : vector<4x256xf32>
    %118 = arith.addf %115, %117 : vector<4x256xf32>
    %cst_71 = arith.constant -1.000000e+00 : f32
    %cst_72 = arith.constant 1.000000e+00 : f32
    %119 = vector.broadcast %cst_71 : f32 to vector<4x256xf32>
    %120 = arith.maximumf %119, %118 : vector<4x256xf32>
    %121 = vector.broadcast %cst_72 : f32 to vector<4x256xf32>
    %122 = arith.minimumf %121, %120 : vector<4x256xf32>
    %c3_73 = arith.constant 3 : index
    %c0_74 = arith.constant 0 : index
    %c0_75 = arith.constant 0 : index
    %123 = vector.load %arg3[%c3_73, %c0_74, %c0_75] : memref<4x256x128xf32, #tpu.memory_space<vmem>>, vector<1x256x128xf32>
    %124 = vector.shape_cast %123 : vector<1x256x128xf32> to vector<256x128xf32>
    %cst_76 = arith.constant dense<0.000000e+00> : vector<4x128xf32>
    %125 = tpu.matmul %122, %124, %cst_76 {dimension_numbers = #tpu.dot_dimension_numbers<[1], [0], [0], [1], [0, 0, 1, 1], [], []>} : vector<4x256xf32>, vector<256x128xf32>, vector<4x128xf32> -> vector<4x128xf32>
    %126 = arith.addf %105, %125 : vector<4x128xf32>
    %cst_77 = arith.constant dense<0xFF800000> : vector<4xf32>
    %127 = vector.multi_reduction <maximumf>, %126, %cst_77 [1] : vector<4x128xf32> to vector<4xf32>
    %128 = vector.shape_cast %127 : vector<4xf32> to vector<4x1xf32>
    %129 = vector.broadcast %128 : vector<4x1xf32> to vector<4x128xf32>
    %130 = arith.subf %126, %129 : vector<4x128xf32>
    %131 = math.exp %130 : vector<4x128xf32>
    %cst_78 = arith.constant dense<0.000000e+00> : vector<4xf32>
    %132 = vector.multi_reduction <add>, %131, %cst_78 [1] : vector<4x128xf32> to vector<4xf32>
    %133 = vector.shape_cast %132 : vector<4xf32> to vector<4x1xf32>
    %134 = vector.broadcast %133 : vector<4x1xf32> to vector<4x128xf32>
    %135 = arith.divf %131, %134 : vector<4x128xf32>
    %cst_79 = arith.constant dense<0.000000e+00> : vector<128xf32>
    %136 = vector.multi_reduction <add>, %135, %cst_79 [0] : vector<4x128xf32> to vector<128xf32>
    %137 = vector.shape_cast %136 : vector<128xf32> to vector<1x128xf32>
    %cst_80 = arith.constant 4.000000e+00 : f32
    %138 = vector.broadcast %cst_80 : f32 to vector<1x128xf32>
    %139 = arith.divf %137, %138 : vector<1x128xf32>
    %140 = vector.shape_cast %139 : vector<1x128xf32> to vector<1x128xf32>
    %141 = vector.broadcast %140 : vector<1x128xf32> to vector<8x128xf32>
    %c0_81 = arith.constant 0 : index
    %c0_82 = arith.constant 0 : index
    %c0_83 = arith.constant 0 : index
    %142 = vector.load %arg5[%c0_81, %c0_82, %c0_83] : memref<1x8x128xf32, #tpu.memory_space<vmem>>, vector<1x8x128xf32>
    %143 = vector.shape_cast %142 : vector<1x8x128xf32> to vector<8x128xf32>
    %144 = vector.shape_cast %141 : vector<8x128xf32> to vector<1x8x128xf32>
    tpu.vector_store %arg5[%c0_81, %c0_82, %c0_83], %144 {strides = array<i32>} : memref<1x8x128xf32, #tpu.memory_space<vmem>>, vector<1x8x128xf32>,
    return
  }
  func.func @transform_0(%arg0: i32) -> (i32, i32, i32) {
    %c0_i32 = arith.constant 0 : i32
    %c0_i32_0 = arith.constant 0 : i32
    %c0_i32_1 = arith.constant 0 : i32
    return %arg0, %c0_i32, %c0_i32_0 : i32, i32, i32
  }
  func.func @transform_1(%arg0: i32) -> (i32, i32, i32, i32) {
    %c0_i32 = arith.constant 0 : i32
    %c0_i32_0 = arith.constant 0 : i32
    %c0_i32_1 = arith.constant 0 : i32
    %c0_i32_2 = arith.constant 0 : i32
    return %arg0, %c0_i32, %c0_i32_0, %c0_i32_1 : i32, i32, i32, i32
  }
  func.func @transform_2(%arg0: i32) -> (i32, i32, i32) {
    %c0_i32 = arith.constant 0 : i32
    %c0_i32_0 = arith.constant 0 : i32
    %c0_i32_1 = arith.constant 0 : i32
    %c0_i32_2 = arith.constant 0 : i32
    return %c0_i32, %c0_i32_0, %c0_i32_1 : i32, i32, i32
  }
  func.func @transform_3(%arg0: i32) -> (i32, i32) {
    %c0_i32 = arith.constant 0 : i32
    %c0_i32_0 = arith.constant 0 : i32
    %c0_i32_1 = arith.constant 0 : i32
    return %c0_i32, %c0_i32_0 : i32, i32
  }
  func.func @transform_4(%arg0: i32) -> (i32, i32, i32) {
    %c0_i32 = arith.constant 0 : i32
    %c0_i32_0 = arith.constant 0 : i32
    %c0_i32_1 = arith.constant 0 : i32
    return %arg0, %c0_i32, %c0_i32_0 : i32, i32, i32
  }
}

</mosaic_0001>

<bundles_post_ra>
// kernel: tpu_custom_call.1
= control target key start
LH: loop header
LB: loop body
LE: loop exit
PB: predicated region body
PF: predicated region fallthrough
CT: control target
= control target key end

     0   :  { %9 = vsyncpa [#allocation3], 0  ;;  %s1905_s0 = inlined_call_operand.hbm [shape: f32[2,4,256], index: 0, kind: input, shape index: {}]   ;;  %s1906_s1 = inlined_call_operand.hbm [shape: f32[2,4,4,256], index: 1, kind: input, shape index: {}]   ;;  %s1907_s2 = inlined_call_operand.hbm [shape: f32[4,256,128], index: 2, kind: input, shape index: {}]   ;;  %s1908_s3 = inlined_call_operand.vmem [shape: f32[1,128], index: 3, kind: input, shape index: {}]   ;;  %s1909_s4 = inlined_call_operand.hbm [shape: f32[2,8,128], index: 4, kind: output, shape index: {}]  }
   0x1   :  { %11 = vsyncpa [#allocation3 + $0x1], 0 }
   0x2   :  { %12 = vsyncpa [#allocation6], 0 }
   0x3   :  { %14 = vsyncpa [#allocation6 + $0x1], 0 }
   0x4   :  { %15 = vsyncpa [#allocation4], 0 }
   0x5   :  { %17 = vsyncpa [#allocation4 + $0x1], 0  ;;  %s1561_s15 = smov 0   ;;  %s1563_s16 = smov 0  }
   0x6   :  { %s1565_s17 = smov 0   ;;  %s1567_s18 = smov 0  }
   0x7 LB: > { %s1582_s19 = sadd.s32 4294967295, %s1528_s18   ;;  %s994_s20 = sadd.s32 4294967294, %s1528_s18   ;;  %s1528_s18 = sphi %s1567_s18, %s1933_s18   ;;  %s1524_s17 = sphi %s1565_s17, %s1932_s17   ;;  %s1520_s16 = sphi %s1563_s16, %s1931_s16   ;;  %s1516_s15 = sphi %s1561_s15, %s1930_s15  }
   0x8   : > { %p43_p0 = scmp.ne.s32.totalorder %s1520_s16, %s1516_s15  ;;  %p1910_p1 = scmp.eq.s32.totalorder %s1582_s19, 0 }
   0x9   : > { %p141_p3 = scmp.eq.s32.totalorder %s994_s20, 1  ;;  %p995_p5 = scmp.ge.s32.totalorder %s1528_s18, 1 }
   0xa   : > { %p1591_p4 = por %p1910_p1, %p43_p0  ;;  %p148_p7 = scmp.lt.s32.totalorder %s1528_s18, 3 }
   0xb   : > { %p1596_p6 = por %p141_p3, %p43_p0  ;;  %s1530_s24 = smov [#allocation7]  }
   0xc   : > { %s1915_s21 = scalar_select %p1591_p4, 1, 0 }
   0xd   : > { %s1916_s22 = scalar_select %p1596_p6, 1, 0 }
   0xe   : > { %p1601_p8 = pnand %p995_p5, %p148_p7  ;;  %s160_s25 = sshll.u32 %s1530_s24, 4  ;;  %s1605_s25 = int_to_ptr.vmem [resolvable:$true] %s160_s25 }
   0xf   : > { %s1617_s27 = sadd.s32 1, %s1528_s18   ;;  %s30_s28 = sadd.s32 1, %s1524_s17 }
  0x10   : > { %s1917_s23 = scalar_select %p1601_p8, 1, 0 }
  0x11   : > { %p1308_p9 = pneg %p1601_p8  ;;  %s27_s29 = ssub.s32 %s1528_s18, %s1617_s27 }
  0x12   : > { %s1366_s6 = scalar_lea.hbm %s1907_s2, 16384 }
  0x13   : > { %p1612_p11 = pnand %p1308_p9, %p1910_p1  ;;  %p1367_p12 = scmp.ne.s32.totalorder %s1907_s2, %s1366_s6 }
  0x14   : > { %p1373_p5 = scmp.lt.u32.totalorder %s1366_s6, %s1907_s2 }
  0x15   : > { %p1368_p13 = pneg %p1612_p11 }
  0x17   : > { %p1369_p0 = pnand %p1368_p13, %p1367_p12 }
  0x19   : > { %p1370_p3 = pneg %p1369_p0 }
  0x1b   : > { %p1375_p7 = pnand %p1373_p5, %p1370_p3 }
  0x1d   : > { %1378 = shalt.err (!%p1375_p7)
}
  0x1e   : > { %s1379_s11 = scalar_lea.vmem %s1605_s25, 16384  ;;  %p1387_p2 = scmp.lt.s32.totalorder %s1605_s25, %s1605_s25 }
  0x1f   : > { %p1380_p9 = scmp.ne.s32.totalorder %s1605_s25, %s1379_s11  ;;  %p1388_p6 = scmp.lt.s32.totalorder %s1379_s11, %s1379_s11 }
  0x21   : > { %p1382_p10 = pnand %p1380_p9, %p1368_p13  ;;  %p1389_p4 = por %p1388_p6, %p1387_p2 }
  0x23   : > { %p1383_p1 = pneg %p1382_p10 }
  0x25   : > { %p1390_p8 = pnand %p1389_p4, %p1383_p1 }
  0x27   : > { %1393 = shalt.err (!%p1390_p8)
}
  0x28   : > { %s1913_s12 = smov 128   ;;  %s1914_s13 = smov 8  }
  0x29   : > { %1311 = dma.hbm_to_vmem [thread:$0]  (!%p1612_p11), %s1907_s2, 16384, %s1605_s25, [#allocation6], %s1913_s12, %s1913_s12, %s1914_s13  }
  0x2a   : > { %p28_p1 = scmp.eq.s32.totalorder %s27_s29, 0  ;;  %p37_p2 = scmp.ne.s32.totalorder %s1524_s17, %s1520_s16 }
  0x2b   : > { %p38_p4 = scmp.eq.s32.totalorder %s1528_s18, 0  ;;  %p1324_p6 = scmp.lt.s32.totalorder %s1528_s18, 2 }
  0x2c   : > { %s1651_s24 = scalar_select %p28_p1, %s1524_s17, %s30_s28  }
  0x2d   : > { %p39_p8 = por %p38_p4, %p37_p2  ;;  %p1919_p10 = scmp.eq.s32.totalorder %s1582_s19, 1 }
  0x2e   : > { %s1660_s26 = sand.u32 1, %s1524_s17   ;;  %s1028_s5 = sshll.u32 %s1528_s18, 7 }
  0x2f   : > { %p1655_p12 = por %p1919_p10, %p37_p2  ;;  %s998_s6 = sshll.u32 %s1660_s26, 3 }
  0x30   : > { %s1667_s7 = scalar_lea.hbm %s1905_s0, %s1028_s5  ;;  %s181_s28 = scalar_lea.vmem [#allocation2], %s998_s6 }
  0x31   : > { %s189_s8 = sshll.u32 %s181_s28, 4  ;;  %p1669_p11 = pnand %p1324_p6, %p39_p8  ;;  %s1673_s8 = int_to_ptr.vmem [resolvable:$true] %s189_s8 }
  0x32   : > { %s1001_s10 = sshll.u32 %s1660_s26, 5  ;;  %s178_s11 = scalar_lea.sflag [#allocation3], %s1660_s26 }
  0x33   : > { %s1394_s14 = scalar_lea.hbm %s1667_s7, 128  ;;  %p1396_p0 = pneg %p1669_p11 }
  0x34   : > { %p1395_p13 = scmp.ne.s32.totalorder %s1667_s7, %s1394_s14  ;;  %s1399_s6 = scalar_lea.hbm %s1905_s0, 256 }
  0x35   : > { %p1400_p7 = scmp.lt.u32.totalorder %s1667_s7, %s1905_s0  ;;  %p1401_p9 = scmp.lt.u32.totalorder %s1399_s6, %s1394_s14 }
  0x36   : > { %p1397_p3 = pnand %p1396_p0, %p1395_p13  ;;  %p1403_p2 = scmp.lt.u32.totalorder %s1394_s14, %s1667_s7 }
  0x37   : > { %p1402_p1 = por %p1401_p9, %p1400_p7 }
  0x38   : > { %p1398_p5 = pneg %p1397_p3 }
  0x39   : > { %p1404_p4 = por %p1403_p2, %p1402_p1 }
  0x3b   : > { %p1405_p6 = pnand %p1404_p4, %p1398_p5 }
  0x3d   : > { %1408 = shalt.err (!%p1405_p6)
}
  0x3e   : > { %s1409_s28 = scalar_lea.vmem %s1673_s8, 128  ;;  %s1533_s20 = smov [#allocation2]  }
  0x3f   : > { %p1410_p8 = scmp.ne.s32.totalorder %s1673_s8, %s1409_s28  ;;  %s1414_s5 = sshll.u32 %s1533_s20, 4  ;;  %s1415_s5 = int_to_ptr.vmem [resolvable:$false] %s1414_s5 }
  0x40   : > { %s1416_s25 = scalar_lea.vmem %s1415_s5, 256  ;;  %p1417_p3 = scmp.lt.s32.totalorder %s1673_s8, %s1415_s5 }
  0x41   : > { %p1412_p10 = pnand %p1410_p8, %p1396_p0  ;;  %p1418_p7 = scmp.lt.s32.totalorder %s1416_s25, %s1409_s28 }
  0x43   : > { %p1413_p13 = pneg %p1412_p10  ;;  %p1419_p9 = por %p1418_p7, %p1417_p3 }
  0x45   : > { %p1420_p1 = pnand %p1419_p9, %p1413_p13 }
  0x47   : > { %1423 = shalt.err (!%p1420_p1)
}
  0x48   : > { %1315 = dma.hbm_to_vmem [thread:$0]  (!%p1669_p11), %s1667_s7, 128, %s1673_s8, %s178_s11  }
  0x49   : > { %s200_s14 = scalar_lea.vmem [#allocation5], %s1001_s10  ;;  %s196_s29 = sand.u32 1, %s1528_s18  }
  0x4a   : > { %s207_s6 = sshll.u32 %s200_s14, 4  ;;  %s1029_s20 = sshll.u32 %s1528_s18, 9  ;;  %s1705_s6 = int_to_ptr.vmem [resolvable:$true] %s207_s6 }
  0x4b   : > { %s1711_s25 = scalar_lea.hbm %s1906_s1, %s1029_s20  ;;  %s1713_s12 = scalar_lea.sflag [#allocation6], %s196_s29 }
  0x4c   : > { %s1424_s13 = scalar_lea.hbm %s1711_s25, 512  ;;  %s1429_s8 = scalar_lea.hbm %s1906_s1, 1024 }
  0x4d   : > { %p1425_p5 = scmp.ne.s32.totalorder %s1711_s25, %s1424_s13  ;;  %p1430_p6 = scmp.lt.u32.totalorder %s1711_s25, %s1906_s1 }
  0x4e   : > { %p1431_p8 = scmp.lt.u32.totalorder %s1429_s8, %s1424_s13  ;;  %p1433_p13 = scmp.lt.u32.totalorder %s1424_s13, %s1711_s25 }
  0x4f   : > { %p1427_p2 = pnand %p1425_p5, %p1396_p0 }
  0x50   : > { %p1432_p10 = por %p1431_p8, %p1430_p6 }
  0x51   : > { %p1428_p4 = pneg %p1427_p2 }
  0x52   : > { %p1434_p3 = por %p1433_p13, %p1432_p10 }
  0x54   : > { %p1435_p7 = pnand %p1434_p3, %p1428_p4 }
  0x56   : > { %1438 = shalt.err (!%p1435_p7)
}
  0x57   : > { %s1439_s14 = scalar_lea.vmem %s1705_s6, 512  ;;  %s1534_s29 = smov [#allocation5]  }
  0x58   : > { %p1440_p9 = scmp.ne.s32.totalorder %s1705_s6, %s1439_s14  ;;  %s1444_s20 = sshll.u32 %s1534_s29, 4  ;;  %s1445_s20 = int_to_ptr.vmem [resolvable:$false] %s1444_s20 }
  0x59   : > { %s1446_s28 = scalar_lea.vmem %s1445_s20, 1024  ;;  %p1447_p2 = scmp.lt.s32.totalorder %s1705_s6, %s1445_s20 }
  0x5a   : > { %p1442_p1 = pnand %p1440_p9, %p1396_p0  ;;  %p1448_p6 = scmp.lt.s32.totalorder %s1446_s28, %s1439_s14 }
  0x5c   : > { %p1443_p5 = pneg %p1442_p1  ;;  %p1449_p8 = por %p1448_p6, %p1447_p2 }
  0x5e   : > { %p1450_p10 = pnand %p1449_p8, %p1443_p5 }
  0x60   : > { %1453 = shalt.err (!%p1450_p10)
}
  0x61   : > { %s1922_s13 = smov 8   ;;  %s1923_s5 = smov 128  }
  0x62   : > { %1318 = dma.hbm_to_vmem [thread:$0]  (!%p1669_p11), %s1711_s25, 512, %s1705_s6, %s1713_s12, %s1923_s5, %s1923_s5, %s1922_s13  }
  0x63   : > { %p1924_p0 = scmp.ne.s32.totalorder %s1917_s23, 0 }
  0x64   : > { %s1745_s26 = sand.u32 (!%p1924_p0), 1, %s1520_s16   ;;  %p1925_p4 = scmp.ne.s32.totalorder (!%p1924_p0), %s1915_s21, 0 }
  0x65   : > { %219 = sbr.rel (%p1924_p0) target bundleno = 754 (0x2f2), region = 36  ;;  %s1005_s7 = sshll.u32 (!%p1924_p0), %s1745_s26, 3 }
  0x66   : > { %s222_s8 = scalar_lea.sflag (!%p1924_p0), [#allocation3], %s1745_s26  ;;  %s1751_s9 = scalar_lea.vmem (!%p1924_p0), [#allocation2], %s1005_s7 }
  0x6c   : > { %1499 = dma.done.wait (%p1925_p4), %s222_s8, 128  }
  0x6d   : > { %1501 = vsyncadd (%p1925_p4), %s222_s8, 4294967168  ;;  %s230_s23 = sand.u32 1, %s1582_s19   ;;  %s1006_s12 = sshll.u32 %s1745_s26, 5 }
  0x6e   : > { %s231_s6 = scalar_lea.sflag [#allocation6], %s230_s23  ;;  %s1759_s25 = scalar_lea.vmem [#allocation5], %s1006_s12 }
  0x6f   : > { %1503 = dma.done.wait (%p1925_p4), %s231_s6, 512  }
  0x70   : > { %1505 = vsyncadd (%p1925_p4), %s231_s6, 4294966784  ;;  %p1926_p11 = scmp.eq.s32.totalorder %s1582_s19, 0 }
  0x72   : > { %1507 = dma.done.wait (%p1926_p11), [#allocation6], 16384   ;;  %p1927_p13 = pmov %p1926_p11 }
  0x73   : > { %v397_v0 = vld [vmem:[#allocation7 + $0x80] sm:$0xff]  ;;  %v398_v1 = vld [vmem:[#allocation7 + $0x88] sm:$0xff]  ;;  %v399_v11 = vld [vmem:[#allocation7 + $0x90] sm:$0xff]  ;;  %v273_v52 = vlaneseq  ;;  %vm856_vm0 = vcmask 1043456   ;;  %s1025_s11 = sshll.u32 %s1582_s19, 7  ;;  %s267_s14 = scalar_lea.vmem [#allocation8], %s1005_s7 }
  0x74   : > { %1509 = vsyncadd (%p1927_p13), [#allocation6], 4294950912  ;;  %v381_v2 = vld [vmem:[#allocation7] sm:$0xff]  ;;  %v1170_v3 = vpack.c.bf16 %v398_v1, %v397_v0  ;;  %v382_v4 = vld [vmem:[#allocation7 + $0x8] sm:$0xff]  ;;  %s892_s29 = sshll.u32 %s267_s14, 4  ;;  %s1861_s13 = scalar_lea.hbm %s1909_s4, %s1025_s11  ;;  %s1863_s29 = int_to_ptr.vmem [resolvable:$true] %s892_s29 }
  0x75   : > { %v521_v5 = vld [vmem:[#allocation7 + $0x180] sm:$0xff]  ;;  %v522_v6 = vld [vmem:[#allocation7 + $0x188] sm:$0xff]  ;;  %v1172_v7 = vpack.c.bf16 %v382_v4, %v381_v2  ;;  %v400_v13 = vld [vmem:[#allocation7 + $0x98] sm:$0xff]  ;;  %s879_s5 = scalar_lea.sflag [#allocation4], %s1745_s26  ;;  %s1454_s8 = scalar_lea.vmem %s1863_s29, 128 }
  0x76   : > { %v1202_v8 = vpack.c.bf16 %v522_v6, %v521_v5  ;;  %v505_v9 = vld [vmem:[#allocation7 + $0x100] sm:$0xff]  ;;  %v506_v10 = vld [vmem:[#allocation7 + $0x108] sm:$0xff]  ;;  %1171 = vmatprep.subr.bf16.mxu0 %v1170_v3  ;;  %v383_v14 = vld [vmem:[#allocation7 + $0x10] sm:$0xff]  ;;  %v1174_v16 = vpack.c.bf16 %v400_v13, %v399_v11  ;;  %p1455_p3 = scmp.ne.s32.totalorder %s1863_s29, %s1454_s8  ;;  %s1535_s19 = smov [#allocation8]  }
  0x77   : > { %v1204_v12 = vpack.c.bf16 %v506_v10, %v505_v9  ;;  %v384_v15 = vld [vmem:[#allocation7 + $0x18] sm:$0xff]  ;;  %1173 = vmatpush3.bf16.msra.mxu0 %v1172_v7  ;;  %v523_v18 = vld [vmem:[#allocation7 + $0x190] sm:$0xff]  ;;  %v401_v23 = vld [vmem:[#allocation7 + $0xa0] sm:$0xff]  ;;  %v274_v7 = vshrl.u32 %v273_v52, 7  ;;  %s1458_s7 = sshll.u32 %s1535_s19, 4  ;;  %s1459_s7 = int_to_ptr.vmem [resolvable:$false] %s1458_s7 }
  0x78   : > { %1203 = vmatprep.subr.bf16.mxu1 %v1202_v8  ;;  %v1176_v17 = vpack.c.bf16 %v384_v15, %v383_v14  ;;  %v524_v19 = vld [vmem:[#allocation7 + $0x198] sm:$0xff]  ;;  %v507_v20 = vld [vmem:[#allocation7 + $0x110] sm:$0xff]  ;;  %v402_v24 = vld [vmem:[#allocation7 + $0xa8] sm:$0xff]  ;;  %1175 = vmatprep.subr.bf16.mxu0 %v1174_v16  ;;  %p1456_p7 = pnand %p1455_p3, %p1655_p12  ;;  %p1461_p1 = scmp.lt.s32.totalorder %s1863_s29, %s1459_s7 }
  0x79   : > { %1205 = vmatpush3.bf16.msra.mxu1 %v1204_v12  ;;  %v1206_v21 = vpack.c.bf16 %v524_v19, %v523_v18  ;;  %v508_v22 = vld [vmem:[#allocation7 + $0x118] sm:$0xff]  ;;  %v1178_v26 = vpack.c.bf16 %v402_v24, %v401_v23  ;;  %v385_v27 = vld [vmem:[#allocation7 + $0x20] sm:$0xff]  ;;  %v386_v28 = vld [vmem:[#allocation7 + $0x28] sm:$0xff] }
  0x7a   : > { %v1208_v25 = vpack.c.bf16 %v508_v22, %v507_v20  ;;  %v525_v29 = vld [vmem:[#allocation7 + $0x1a0] sm:$0xff]  ;;  %v526_v30 = vld [vmem:[#allocation7 + $0x1a8] sm:$0xff]  ;;  %v1180_v33 = vpack.c.bf16 %v386_v28, %v385_v27  ;;  %v403_v35 = vld [vmem:[#allocation7 + $0xb0] sm:$0xff]  ;;  %p1457_p9 = pneg %p1456_p7 }
  0x7b   : > { %1207 = vmatprep.subr.bf16.mxu1 %v1206_v21  ;;  %v509_v31 = vld [vmem:[#allocation7 + $0x120] sm:$0xff]  ;;  %v510_v32 = vld [vmem:[#allocation7 + $0x128] sm:$0xff]  ;;  %1177 = vmatpush3.bf16.msra.mxu0 %v1176_v17  ;;  %v1210_v34 = vpack.c.bf16 %v526_v30, %v525_v29  ;;  %v404_v36 = vld [vmem:[#allocation7 + $0xb8] sm:$0xff] }
  0x7c   : > { %v387_v37 = vld [vmem:[#allocation7 + $0x30] sm:$0xff]  ;;  %1179 = vmatprep.subr.bf16.mxu0 %v1178_v26  ;;  %v1212_v38 = vpack.c.bf16 %v510_v32, %v509_v31  ;;  %v1182_v39 = vpack.c.bf16 %v404_v36, %v403_v35  ;;  %v388_v40 = vld [vmem:[#allocation7 + $0x38] sm:$0xff]  ;;  %v405_v46 = vld [vmem:[#allocation7 + $0xc0] sm:$0xff]  ;;  %v1779_v26 = vsub.s32 0, %v274_v7 }
  0x7d   : > { %1209 = vmatpush3.bf16.msra.mxu1 %v1208_v25  ;;  %v527_v41 = vld [vmem:[#allocation7 + $0x1b0] sm:$0xff]  ;;  %v528_v42 = vld [vmem:[#allocation7 + $0x1b8] sm:$0xff]  ;;  %v406_v47 = vld [vmem:[#allocation7 + $0xc8] sm:$0xff]  ;;  %v1184_v48 = vpack.c.bf16 %v388_v40, %v387_v37  ;;  %v1777_v25 = vsub.s32 1, %v274_v7 }
  0x7e   : > { %1211 = vmatprep.subr.bf16.mxu1 %v1210_v34  ;;  %v1214_v43 = vpack.c.bf16 %v528_v42, %v527_v41  ;;  %v511_v44 = vld [vmem:[#allocation7 + $0x130] sm:$0xff]  ;;  %v512_v45 = vld [vmem:[#allocation7 + $0x138] sm:$0xff]  ;;  %v389_v49 = vld [vmem:[#allocation7 + $0x40] sm:$0xff]  ;;  %v1186_v54 = vpack.c.bf16 %v406_v47, %v405_v46 }
  0x7f   : > { %1181 = vmatpush3.bf16.msra.mxu0 %v1180_v33  ;;  %v529_v50 = vld [vmem:[#allocation7 + $0x1c0] sm:$0xff]  ;;  %v530_v51 = vld [vmem:[#allocation7 + $0x1c8] sm:$0xff]  ;;  %v1216_v53 = vpack.c.bf16 %v512_v45, %v511_v44  ;;  %v407_v59 = vld [vmem:[#allocation7 + $0xd0] sm:$0xff] }
  0x80   : > { %1183 = vmatprep.subr.bf16.mxu0 %v1182_v39  ;;  %v390_v55 = vld [vmem:[#allocation7 + $0x48] sm:$0xff]  ;;  %v513_v56 = vld [vmem:[#allocation7 + $0x140] sm:$0xff]  ;;  %v1218_v58 = vpack.c.bf16 %v530_v51, %v529_v50  ;;  %v408_v60 = vld [vmem:[#allocation7 + $0xd8] sm:$0xff] }
  0x81   : > { %1213 = vmatpush3.bf16.msra.mxu1 %v1212_v38  ;;  %v514_v57 = vld [vmem:[#allocation7 + $0x148] sm:$0xff]  ;;  %v531_v61 = vld [vmem:[#allocation7 + $0x1d0] sm:$0xff]  ;;  %v392_v63 = vld [vmem:[#allocation7 + $0x58] sm:$0xff]  ;;  %v1188_v3 = vpack.c.bf16 %v390_v55, %v389_v49  ;;  %v1190_v9 = vpack.c.bf16 %v408_v60, %v407_v59 }
  0x82   : > { %1215 = vmatprep.subr.bf16.mxu1 %v1214_v43  ;;  %v391_v62 = vld [vmem:[#allocation7 + $0x50] sm:$0xff]  ;;  %v532_v0 = vld [vmem:[#allocation7 + $0x1d8] sm:$0xff]  ;;  %v409_v4 = vld [vmem:[#allocation7 + $0xe0] sm:$0xff]  ;;  %v1220_v8 = vpack.c.bf16 %v514_v57, %v513_v56 }
  0x83   : > { %v515_v1 = vld [vmem:[#allocation7 + $0x150] sm:$0xff]  ;;  %v516_v2 = vld [vmem:[#allocation7 + $0x158] sm:$0xff]  ;;  %1185 = vmatpush3.bf16.msra.mxu0 %v1184_v48  ;;  %v410_v5 = vld [vmem:[#allocation7 + $0xe8] sm:$0xff]  ;;  %v1222_v13 = vpack.c.bf16 %v532_v0, %v531_v61  ;;  %v1192_v20 = vpack.c.bf16 %v392_v63, %v391_v62 }
  0x84   : > { %v1769_v6 = vld [vmem:[#allocation7 + $0x60] sm:$0xff]  ;;  %1187 = vmatprep.subr.bf16.mxu0 %v1186_v54  ;;  %v394_v10 = vld [vmem:[#allocation7 + $0x68] sm:$0xff]  ;;  %v411_v16 = vld [vmem:[#allocation7 + $0xf0] sm:$0xff]  ;;  %v1224_v21 = vpack.c.bf16 %v516_v2, %v515_v1  ;;  %v1194_v27 = vpack.c.bf16 %v410_v5, %v409_v4 }
  0x85   : > { %1217 = vmatpush3.bf16.msra.mxu1 %v1216_v53  ;;  %v533_v11 = vld [vmem:[#allocation7 + $0x1e0] sm:$0xff]  ;;  %v534_v12 = vld [vmem:[#allocation7 + $0x1e8] sm:$0xff]  ;;  %v412_v17 = vld [vmem:[#allocation7 + $0xf8] sm:$0xff]  ;;  %v1196_v28 = vpack.c.bf16 %v394_v10, %v1769_v6 }
  0x86   : > { %1219 = vmatprep.subr.bf16.mxu1 %v1218_v58  ;;  %v517_v14 = vld [vmem:[#allocation7 + $0x160] sm:$0xff]  ;;  %v518_v15 = vld [vmem:[#allocation7 + $0x168] sm:$0xff]  ;;  %v1771_v18 = vld [vmem:[#allocation7 + $0x70] sm:$0xff]  ;;  %v1226_v29 = vpack.c.bf16 %v534_v12, %v533_v11  ;;  %v1198_v34 = vpack.c.bf16 %v412_v17, %v411_v16 }
  0x87   : > { %v1773_v19 = vld [vmem:[#allocation7 + $0x78] sm:$0xff]  ;;  %1189 = vmatpush3.bf16.msra.mxu0 %v1188_v3  ;;  %v535_v22 = vld [vmem:[#allocation7 + $0x1f0] sm:$0xff]  ;;  %v270_v32 = vld [vmem:[%s1759_s25] sm:$0xff]  ;;  %v1228_v33 = vpack.c.bf16 %v518_v15, %v517_v14 }
  0x88   : > { %v536_v23 = vld [vmem:[#allocation7 + $0x1f8] sm:$0xff]  ;;  %v1775_v24 = vld [vmem:[#allocation7 + $0x170] sm:$0xff]  ;;  %1191 = vmatprep.subr.bf16.mxu0 %v1190_v9  ;;  %v271_v36 = vmul.f32 0.44947204, %v270_v32  ;;  %v1010_v37 = vld [vmem:[%s1759_s25 + $0x8] sm:$0xff]  ;;  %v1200_v39 = vpack.c.bf16 %v1773_v19, %v1771_v18 }
  0x89   : > { %1221 = vmatpush3.bf16.msra.mxu1 %v1220_v8  ;;  %v1782_v30 = vld [vmem:[#allocation7 + $0x178] sm:$0xff]  ;;  %v1012_v38 = vld [vmem:[%s1759_s25 + $0x10] sm:$0xff]  ;;  %v1230_v40 = vpack.c.bf16 %v536_v23, %v535_v22  ;;  %v293_v43 = vmul.f32 0.44947204, %v1010_v37  ;;  %v645_v7 = vld [vmem:[#allocation7 + $0x280] sm:$0xff] }
  0x8a   : > { %v268_v31 = vld [vmem:[%s1751_s9] ss:$4 sm:$0x3]  ;;  %1223 = vmatprep.subr.bf16.mxu1 %v1222_v13  ;;  %v1232_v41 = vpack.c.bf16 %v1782_v30, %v1775_v24  ;;  %v1009_v42 = vld [vmem:[%s1751_s9 + $0x1] ss:$4 sm:$0x3]  ;;  %v284_v46 = vcombine.high %v271_v36, %v271_v36 }
  0x8b   : > { %v269_v35 = vmul.f32 1.7865888, %v268_v31  ;;  %v1014_v44 = vld [vmem:[%s1759_s25 + $0x18] sm:$0xff]  ;;  %1193 = vmatpush3.bf16.msra.mxu0 %v1192_v20  ;;  %v290_v47 = vmul.f32 1.7865888, %v1009_v42  ;;  %v306_v50 = vcombine.high %v293_v43, %v293_v43  ;;  %v646_v8 = vld [vmem:[#allocation7 + $0x288] sm:$0xff] }
  0x8c   : > { %v1011_v48 = vld [vmem:[%s1751_s9 + $0x2] ss:$4 sm:$0x3]  ;;  %1195 = vmatprep.subr.bf16.mxu0 %v1194_v27  ;;  %v315_v52 = vmul.f32 0.44947204, %v1012_v38  ;;  %v1234_v19 = vpack.c.bf16 %v646_v8, %v645_v7  ;;  %v770_v22 = vld [vmem:[#allocation7 + $0x388] sm:$0xff] }
  0x8d   : > { %v280_v45 = vrot.slane %v269_v35, %v1777_v25  ;;  %v276_v49 = vrot.slane %v269_v35, %v1779_v26  ;;  %1225 = vmatpush3.bf16.msra.mxu1 %v1224_v21  ;;  %v312_v51 = vmul.f32 1.7865888, %v1011_v48  ;;  %v337_v53 = vmul.f32 0.44947204, %v1014_v44  ;;  %v769_v21 = vld [vmem:[#allocation7 + $0x380] sm:$0xff]  ;;  %v630_v32 = vld [vmem:[#allocation7 + $0x208] sm:$0xff] }
  0x8e   : > { %1227 = vmatprep.subr.bf16.mxu1 %v1226_v29  ;;  %v302_v55 = vrot.slane %v290_v47, %v1777_v25  ;;  %v1013_v56 = vld [vmem:[%s1751_s9 + $0x3] ss:$4 sm:$0x3]  ;;  %v298_v58 = vrot.slane %v290_v47, %v1779_v26  ;;  %v328_v60 = vcombine.high %v315_v52, %v315_v52  ;;  %v629_v31 = vld [vmem:[#allocation7 + $0x200] sm:$0xff]  ;;  %v634_v7 = vld [vmem:[#allocation7 + $0x228] sm:$0xff]  ;;  %s1460_s9 = scalar_lea.vmem %s1459_s7, 256 }
  0x8f   : > { %v1797_v54 = vadd.f32 %v284_v46, %v280_v45  ;;  %v1801_v57 = vadd.f32 %v276_v49, %v271_v36  ;;  %v324_v59 = vrot.slane %v312_v51, %v1777_v25  ;;  %v334_v61 = vmul.f32 1.7865888, %v1013_v56  ;;  %1197 = vmatpush3.bf16.msra.mxu0 %v1196_v28  ;;  %v650_v56 = vld [vmem:[#allocation7 + $0x2a8] sm:$0xff]  ;;  %p1462_p5 = scmp.lt.s32.totalorder %s1460_s9, %s1454_s8 }
  0x90   : > { %v350_v62 = vcombine.high %v337_v53, %v337_v53  ;;  %v1805_v63 = vadd.f32 %v306_v50, %v302_v55  ;;  %v1808_v1 = vadd.f32 %v298_v58, %v293_v43  ;;  %v320_v2 = vrot.slane %v312_v51, %v1779_v26  ;;  %1199 = vmatprep.subr.bf16.mxu0 %v1198_v34  ;;  %v631_v51 = vld [vmem:[#allocation7 + $0x210] sm:$0xff]  ;;  %v649_v55 = vld [vmem:[#allocation7 + $0x2a0] sm:$0xff] }
  0x91   : > { %v362_v0 = vmul.f32 1.2423469, %v1797_v54  ;;  %1229 = vmatpush3.bf16.msra.mxu1 %v1228_v33  ;;  %v1811_v3 = vadd.f32 %v328_v60, %v324_v59  ;;  %v346_v4 = vrot.slane %v334_v61, %v1777_v25  ;;  %v342_v5 = vrot.slane %v334_v61, %v1779_v26  ;;  %v753_v59 = vld [vmem:[#allocation7 + $0x300] sm:$0xff]  ;;  %v754_v60 = vld [vmem:[#allocation7 + $0x308] sm:$0xff]  ;;  %p1463_p2 = por %p1462_p5, %p1461_p1 }
  0x92   : > { %v361_v6 = vmul.f32 1.2423469, %v1801_v57  ;;  %1231 = vmatprep.subr.bf16.mxu1 %v1230_v40  ;;  %v366_v10 = vmul.f32 0.06594122, %v1805_v63  ;;  %v1817_v11 = vadd.f32 %v320_v2, %v315_v52  ;;  %v365_v12 = vmul.f32 0.06594122, %v1808_v1 }
  0x93   : > { %v364_v9 = vadd.f32 -1.2807921, %v362_v0  ;;  %v1820_v13 = vadd.f32 %v350_v62, %v346_v4  ;;  %v370_v14 = vmul.f32 0.05989138, %v1811_v3  ;;  %v1823_v15 = vadd.f32 %v342_v5, %v337_v53  ;;  %1201 = vmatpush3.bf16.msra.mxu0 %v1200_v39  ;;  %v647_v39 = vld [vmem:[#allocation7 + $0x290] sm:$0xff]  ;;  %v648_v40 = vld [vmem:[#allocation7 + $0x298] sm:$0xff]  ;;  %p1464_p6 = pnand %p1463_p2, %p1457_p9 }
  0x94   : > { %v363_v16 = vadd.f32 -1.2807921, %v361_v6  ;;  %v369_v18 = vmul.f32 0.05989138, %v1817_v11  ;;  %v485_v20 = vmul.f32 0.102427766, %v1797_v54  ;;  %1235 = vmatprep.subr.bf16.mxu0 %v1234_v19  ;;  %v1266_v33 = vpack.c.bf16 %v770_v22, %v769_v21 }
  0x95   : > { %v368_v17 = vadd.f32 %v366_v10, %v364_v9  ;;  %1233 = vmatpush3.bf16.msra.mxu1 %v1232_v41  ;;  %v374_v23 = vmul.f32 0.058307644, %v1820_v13  ;;  %v373_v25 = vmul.f32 0.058307644, %v1823_v15  ;;  %v489_v26 = vmul.f32 1.0122681, %v1805_v63 }
  0x96   : > { %v367_v24 = vadd.f32 %v365_v12, %v363_v16  ;;  %v487_v28 = vadd.f32 -1.0300995, %v485_v20  ;;  %v493_v29 = vmul.f32 0.0034846824, %v1811_v3  ;;  %v484_v34 = vmul.f32 0.102427766, %v1801_v57  ;;  %1267 = vmatprep.subr.bf16.mxu1 %v1266_v33 }
  0x97   : > { %v372_v27 = vadd.f32 %v370_v14, %v368_v17  ;;  %v497_v37 = vmul.f32 0.027333854, %v1820_v13  ;;  %v488_v38 = vmul.f32 1.0122681, %v1808_v1  ;;  %v492_v43 = vmul.f32 0.0034846824, %v1817_v11 }
  0x98   : > { %v371_v30 = vadd.f32 %v369_v18, %v367_v24  ;;  %v491_v36 = vadd.f32 %v489_v26, %v487_v28  ;;  %v486_v42 = vadd.f32 -1.0300995, %v484_v34  ;;  %v1236_v46 = vpack.c.bf16 %v630_v32, %v629_v31  ;;  %v632_v52 = vld [vmem:[#allocation7 + $0x218] sm:$0xff]  ;;  %v771_v0 = vld [vmem:[#allocation7 + $0x390] sm:$0xff]  ;;  %v633_v6 = vld [vmem:[#allocation7 + $0x220] sm:$0xff] }
  0x99   : > { %v376_v35 = vadd.f32 %v374_v23, %v372_v27  ;;  %v496_v49 = vmul.f32 0.027333854, %v1823_v15  ;;  %v1238_v50 = vpack.c.bf16 %v648_v40, %v647_v39  ;;  %v1240_v62 = vpack.c.bf16 %v632_v52, %v631_v51  ;;  %v772_v2 = vld [vmem:[#allocation7 + $0x398] sm:$0xff]  ;;  %v651_v10 = vld [vmem:[#allocation7 + $0x2b0] sm:$0xff]  ;;  %v773_v22 = vld [vmem:[#allocation7 + $0x3a0] sm:$0xff] }
  0x9a   : > { %v375_v41 = vadd.f32 %v373_v25, %v371_v30  ;;  %v495_v45 = vadd.f32 %v493_v29, %v491_v36  ;;  %v490_v48 = vadd.f32 %v488_v38, %v486_v42  ;;  %v1242_v5 = vpack.c.bf16 %v650_v56, %v649_v55  ;;  %v652_v12 = vld [vmem:[#allocation7 + $0x2b8] sm:$0xff]  ;;  %v755_v18 = vld [vmem:[#allocation7 + $0x310] sm:$0xff]  ;;  %v774_v23 = vld [vmem:[#allocation7 + $0x3a8] sm:$0xff] }
  0x9b   : > { %v1017_v44 = vclamps-f32 %v376_v35, 1.0  ;;  %v609_v8 = vmul.f32 -0.0103422105, %v1797_v54  ;;  %v1268_v9 = vpack.c.bf16 %v754_v60, %v753_v59  ;;  %v613_v14 = vmul.f32 0.009538565, %v1805_v63  ;;  %v756_v19 = vld [vmem:[#allocation7 + $0x318] sm:$0xff] }
  0x9c   : > { %v1016_v47 = vclamps-f32 %v375_v41, 1.0  ;;  %v499_v53 = vadd.f32 %v497_v37, %v495_v45  ;;  %v494_v58 = vadd.f32 %v492_v43, %v490_v48  ;;  %v1270_v17 = vpack.c.bf16 %v772_v2, %v771_v0  ;;  %v635_v26 = vld [vmem:[#allocation7 + $0x230] sm:$0xff]  ;;  %v636_v27 = vld [vmem:[#allocation7 + $0x238] sm:$0xff]  ;;  %v653_v31 = vld [vmem:[#allocation7 + $0x2c0] sm:$0xff] }
  0x9d   : > { %477 = vmatprep.mubr.f32.mxu0 %v1017_v44  ;;  %v611_v20 = vadd.f32 -1.0038835, %v609_v8  ;;  %v1244_v21 = vpack.c.bf16 %v634_v7, %v633_v6  ;;  %v617_v24 = vmul.f32 1.167557, %v1811_v3  ;;  %v1246_v25 = vpack.c.bf16 %v652_v12, %v651_v10  ;;  %v654_v32 = vld [vmem:[#allocation7 + $0x2c8] sm:$0xff]  ;;  %v757_v34 = vld [vmem:[#allocation7 + $0x320] sm:$0xff] }
  0x9e   : > { %478 = vmatmul.mubr.f32.vlgmr.msra.gmra.mrb[0].mxu0 %v1016_v47  ;;  %v1019_v61 = vclamps-f32 %v499_v53, 1.0  ;;  %v498_v4 = vadd.f32 %v496_v49, %v494_v58  ;;  %v621_v29 = vmul.f32 -0.040646978, %v1820_v13  ;;  %v1272_v30 = vpack.c.bf16 %v756_v19, %v755_v18  ;;  %v758_v35 = vld [vmem:[#allocation7 + $0x328] sm:$0xff]  ;;  %v775_v39 = vld [vmem:[#allocation7 + $0x3b0] sm:$0xff]  ;;  %v776_v40 = vld [vmem:[#allocation7 + $0x3b8] sm:$0xff] }
  0x9f   : > { %1237 = vmatpush3.bf16.msra.mxu0 %v1236_v46  ;;  %v615_v28 = vadd.f32 %v613_v14, %v611_v20  ;;  %v1274_v33 = vpack.c.bf16 %v774_v23, %v773_v22  ;;  %v608_v37 = vmul.f32 -0.0103422105, %v1801_v57  ;;  %v1248_v38 = vpack.c.bf16 %v636_v27, %v635_v26  ;;  %v759_v41 = vld [vmem:[#allocation7 + $0x330] sm:$0xff]  ;;  %v637_v43 = vld [vmem:[#allocation7 + $0x240] sm:$0xff]  ;;  %v638_v44 = vld [vmem:[#allocation7 + $0x248] sm:$0xff] }
  0xa0   : > { %1239 = vmatprep.subr.bf16.mxu0 %v1238_v50  ;;  %601 = vmatprep.mubr.f32.mxu1 %v1019_v61  ;;  %v1018_v16 = vclamps-f32 %v498_v4, 1.0  ;;  %v1250_v42 = vpack.c.bf16 %v654_v32, %v653_v31  ;;  %v1276_v46 = vpack.c.bf16 %v758_v35, %v757_v34  ;;  %v655_v47 = vld [vmem:[#allocation7 + $0x2d0] sm:$0xff]  ;;  %v656_v48 = vld [vmem:[#allocation7 + $0x2d8] sm:$0xff]  ;;  %v612_v49 = vmul.f32 0.009538565, %v1808_v1  ;;  %v777_v59 = vld [vmem:[#allocation7 + $0x3c0] sm:$0xff] }
  0xa1   : > { %v619_v36 = vadd.f32 %v617_v24, %v615_v28  ;;  %v733_v50 = vmul.f32 0.017789312, %v1797_v54  ;;  %v1278_v51 = vpack.c.bf16 %v776_v40, %v775_v39  ;;  %v760_v52 = vld [vmem:[#allocation7 + $0x338] sm:$0xff]  ;;  %v610_v55 = vadd.f32 -1.0038835, %v608_v37  ;;  %v778_v60 = vld [vmem:[#allocation7 + $0x3c8] sm:$0xff] }
  0xa2   : > { %602 = vmatmul.mubr.f32.vlgmr.msra.gmra.mrb[0].mxu1 %v1018_v16  ;;  %v737_v56 = vmul.f32 -0.048505455, %v1805_v63  ;;  %v1252_v58 = vpack.c.bf16 %v638_v44, %v637_v43  ;;  %v1254_v0 = vpack.c.bf16 %v656_v48, %v655_v47  ;;  %v639_v2 = vld [vmem:[#allocation7 + $0x250] sm:$0xff]  ;;  %v640_v4 = vld [vmem:[#allocation7 + $0x258] sm:$0xff]  ;;  %v732_v54 = vmul.f32 0.017789312, %v1801_v57 }
  0xa3   : > { %1241 = vmatpush3.bf16.msra.mxu0 %v1240_v62  ;;  %1269 = vmatpush3.bf16.msra.mxu1 %v1268_v9  ;;  %v623_v45 = vadd.f32 %v621_v29, %v619_v36  ;;  %v735_v61 = vadd.f32 -0.9823486, %v733_v50  ;;  %v741_v62 = vmul.f32 0.09855761, %v1811_v3  ;;  %v657_v6 = vld [vmem:[#allocation7 + $0x2e0] sm:$0xff]  ;;  %v658_v7 = vld [vmem:[#allocation7 + $0x2e8] sm:$0xff]  ;;  %v1282_v9 = vpack.c.bf16 %v778_v60, %v777_v59 }
  0xa4   : > { %1243 = vmatprep.subr.bf16.mxu0 %v1242_v5  ;;  %1271 = vmatprep.subr.bf16.mxu1 %v1270_v17  ;;  %v1280_v5 = vpack.c.bf16 %v760_v52, %v759_v41  ;;  %v745_v63 = vmul.f32 1.0361983, %v1820_v13  ;;  %v761_v10 = vld [vmem:[#allocation7 + $0x340] sm:$0xff]  ;;  %v762_v12 = vld [vmem:[#allocation7 + $0x348] sm:$0xff]  ;;  %v614_v14 = vadd.f32 %v612_v49, %v610_v55  ;;  %v616_v3 = vmul.f32 1.167557, %v1817_v11 }
  0xa5   : > { %v1021_v53 = vclamps-f32 %v623_v45, 1.0  ;;  %v739_v8 = vadd.f32 %v737_v56, %v735_v61  ;;  %v1256_v16 = vpack.c.bf16 %v640_v4, %v639_v2  ;;  %v779_v17 = vld [vmem:[#allocation7 + $0x3d0] sm:$0xff]  ;;  %v780_v18 = vld [vmem:[#allocation7 + $0x3d8] sm:$0xff]  ;;  %v1258_v57 = vpack.c.bf16 %v658_v7, %v657_v6  ;;  %v641_v20 = vld [vmem:[#allocation7 + $0x260] sm:$0xff] }
  0xa6   : > { %v734_v22 = vadd.f32 -0.9823486, %v732_v54  ;;  %v736_v23 = vmul.f32 -0.048505455, %v1808_v1  ;;  %v1284_v13 = vpack.c.bf16 %v762_v12, %v761_v10  ;;  %v659_v24 = vld [vmem:[#allocation7 + $0x2f0] sm:$0xff]  ;;  %v1286_v27 = vpack.c.bf16 %v780_v18, %v779_v17  ;;  %v764_v29 = vld [vmem:[#allocation7 + $0x358] sm:$0xff] }
  0xa7   : > { %1245 = vmatpush3.bf16.msra.mxu0 %v1244_v21  ;;  %1273 = vmatpush3.bf16.msra.mxu1 %v1272_v30  ;;  %v743_v19 = vadd.f32 %v741_v62, %v739_v8  ;;  %v642_v21 = vld [vmem:[#allocation7 + $0x268] sm:$0xff]  ;;  %v763_v28 = vld [vmem:[#allocation7 + $0x350] sm:$0xff]  ;;  %v618_v30 = vadd.f32 %v616_v3, %v614_v14  ;;  %v620_v31 = vmul.f32 -0.040646978, %v1823_v15  ;;  %v644_v37 = vld [vmem:[#allocation7 + $0x278] sm:$0xff] }
  0xa8   : > { %1247 = vmatprep.subr.bf16.mxu0 %v1246_v25  ;;  %1275 = vmatprep.subr.bf16.mxu1 %v1274_v33  ;;  %v660_v25 = vld [vmem:[#allocation7 + $0x2f8] sm:$0xff]  ;;  %v1260_v32 = vpack.c.bf16 %v642_v21, %v641_v20  ;;  %v781_v33 = vld [vmem:[#allocation7 + $0x3e0] sm:$0xff]  ;;  %v782_v34 = vld [vmem:[#allocation7 + $0x3e8] sm:$0xff]  ;;  %v740_v39 = vmul.f32 0.09855761, %v1817_v11  ;;  %v1288_v40 = vpack.c.bf16 %v764_v29, %v763_v28 }
  0xa9   : > { %725 = vmatprep.mubr.f32.mxu0 %v1021_v53  ;;  %v747_v26 = vadd.f32 %v745_v63, %v743_v19  ;;  %v1262_v36 = vpack.c.bf16 %v660_v25, %v659_v24  ;;  %v643_v1 = vld [vmem:[#allocation7 + $0x270] sm:$0xff]  ;;  %v1290_v41 = vpack.c.bf16 %v782_v34, %v781_v33  ;;  %v766_v43 = vld [vmem:[#allocation7 + $0x368] sm:$0xff]  ;;  %v622_v44 = vadd.f32 %v620_v31, %v618_v30  ;;  %v784_v47 = vld [vmem:[#allocation7 + $0x3f8] sm:$0xff] }
  0xaa   : > { %v1264_v45 = vpack.c.bf16 %v644_v37, %v643_v1  ;;  %v744_v49 = vmul.f32 1.0361983, %v1823_v15  ;;  %v768_v52 = vld [vmem:[#allocation7 + $0x378] sm:$0xff]  ;;  %v1015_v15 = vld [vmem:[%s1908_s3] ss:$0 sm:$0xff] }
  0xab   : > { %1249 = vmatpush3.bf16.msra.mxu0 %v1248_v38  ;;  %1277 = vmatpush3.bf16.msra.mxu1 %v1276_v46  ;;  %v1023_v35 = vclamps-f32 %v747_v26, 1.0  ;;  %v738_v38 = vadd.f32 %v736_v23, %v734_v22  ;;  %v783_v46 = vld [vmem:[#allocation7 + $0x3f0] sm:$0xff]  ;;  %v1020_v53 = vclamps-f32 %v622_v44, 1.0 }
  0xac   : > { %1251 = vmatprep.subr.bf16.mxu0 %v1250_v42  ;;  %1279 = vmatprep.subr.bf16.mxu1 %v1278_v51  ;;  %v765_v42 = vld [vmem:[#allocation7 + $0x360] sm:$0xff]  ;;  %v1294_v11 = vpack.c.bf16 %v784_v47, %v783_v46  ;;  %v767_v51 = vld [vmem:[#allocation7 + $0x370] sm:$0xff] }
  0xad   : > { %849 = vmatprep.mubr.f32.mxu1 %v1023_v35  ;;  %v742_v48 = vadd.f32 %v740_v39, %v738_v38  ;;  %v1292_v50 = vpack.c.bf16 %v766_v43, %v765_v42  ;;  %v1296_v56 = vpack.c.bf16 %v768_v52, %v767_v51 }
  0xaf   : > { %1253 = vmatpush3.bf16.msra.mxu0 %v1252_v58  ;;  %1281 = vmatpush3.bf16.msra.mxu1 %v1280_v5  ;;  %v746_v55 = vadd.f32 %v744_v49, %v742_v48 }
  0xb0   : > { %1255 = vmatprep.subr.bf16.mxu0 %v1254_v0  ;;  %1283 = vmatprep.subr.bf16.mxu1 %v1282_v9 }
  0xb1   : > { %v1022_v58 = vclamps-f32 %v746_v55, 1.0 }
  0xb3   : > { %1257 = vmatpush3.bf16.msra.mxu0 %v1256_v16  ;;  %1285 = vmatpush3.bf16.msra.mxu1 %v1284_v13 }
  0xb4   : > { %1259 = vmatprep.subr.bf16.mxu0 %v1258_v57  ;;  %1287 = vmatprep.subr.bf16.mxu1 %v1286_v27 }
  0xb7   : > { %1261 = vmatpush3.bf16.msra.mxu0 %v1260_v32  ;;  %1289 = vmatpush3.bf16.msra.mxu1 %v1288_v40 }
  0xb8   : > { %1263 = vmatprep.subr.bf16.mxu0 %v1262_v36  ;;  %1291 = vmatprep.subr.bf16.mxu1 %v1290_v41 }
  0xbb   : > { %1265 = vmatpush3.bf16.msra.mxu0 %v1264_v45  ;;  %1293 = vmatpush3.bf16.msra.mxu1 %v1292_v50 }
  0xbc   : > { %1295 = vmatprep.subr.bf16.mxu1 %v1294_v11 }
  0xbe   : > { %726 = vmatmul.mubr.f32.vlgmr.msra.gmra.mrb[2].mxu0 %v1020_v53 }
  0xbf   : > { %1297 = vmatpush3.bf16.msra.mxu1 %v1296_v56 }
  0xc2   : > { %850 = vmatmul.mubr.f32.vlgmr.msra.gmra.mrb[2].mxu1 %v1022_v58 }
 0x171   : > { %v1062_v59 = vpop.f32.mrb[0].mxu0 }
 0x172   : > { %v1063_v60 = vpop.f32.mrb[1].mxu0 }
 0x173   : > { %v1064_v61 = vadd.f32 %v1063_v60, %v1062_v59 }
 0x175   : > { %v483_v62 = vadd.f32 %v1064_v61, %v1015_v15  ;;  %v1097_v0 = vpop.f32.mrb[0].mxu1 }
 0x176   : > { %v1098_v2 = vpop.f32.mrb[1].mxu1 }
 0x177   : > { %v1099_v4 = vadd.f32 %v1098_v2, %v1097_v0 }
 0x179   : > { %v607_v54 = vadd.f32 %v1099_v4, %v483_v62 }
 0x191   : > { %v1132_v5 = vpop.f32.mrb[2].mxu0 }
 0x192   : > { %v1133_v6 = vpop.f32.mrb[3].mxu0 }
 0x193   : > { %v1134_v7 = vadd.f32 %v1133_v6, %v1132_v5 }
 0x195   : > { %v731_v8 = vadd.f32 %v1134_v7, %v607_v54  ;;  %v1167_v63 = vpop.f32.mrb[2].mxu1 }
 0x196   : > { %v1168_v9 = vpop.f32.mrb[3].mxu1 }
 0x197   : > { %v1169_v10 = vadd.f32 %v1168_v9, %v1167_v63 }
 0x199   : > { %v855_v12 = vadd.f32 %v1169_v10, %v731_v8 }
 0x19b   : > { %v857_v14 = vsel %vm856_vm0, %v855_v12, -inf }
 0x19c   : > { %858 = vmax.xlane.f32.xlu0 %v857_v14 }
 0x229   : > { %v859_v3 = vpop.xlane.xlu0 %858 }
 0x22a   : > { %v860_v16 = vsub.f32 %v855_v12, %v859_v3 }
 0x22c   : > { %v861_v17 = vmul.f32 1.442695, %v860_v16 }
 0x22e   : > { %1362 = vpow2.f32 %v861_v17 }
 0x238   : > { %v1363_v18 = vpop.eup %1362 }
 0x239   : > { %v863_v19 = vsel %vm856_vm0, %v1363_v18, 0.0 }
 0x23a   : > { %864 = vadd.xlane.f32.xlu0 %v863_v19 }
 0x2c7   : > { %v865_v57 = vpop.xlane.xlu0 %864 }
 0x2c8   : > { %1364 = vrcp.f32 %v865_v57 }
 0x2d2   : > { %v1365_v20 = vpop.eup %1364 }
 0x2d3   : > { %v867_v21 = vmul.f32 %v1365_v20, %v1363_v18 }
 0x2d5   : > { %v868_v22 = vsel %vm856_vm0, %v867_v21, 0.0 }
 0x2d6   : > { %v869_v23 = vrot.slane %v868_v22, 4 }
 0x2d8   : > { %v870_v13 = vadd.f32 %v869_v23, %v868_v22 }
 0x2da   : > { %v871_v24 = vrot.slane %v870_v13, 2 }
 0x2dc   : > { %v872_v25 = vadd.f32 %v871_v24, %v870_v13 }
 0x2de   : > { %v873_v26 = vrot.slane %v872_v25, 1 }
 0x2e0   : > { %v874_v27 = vadd.f32 %v873_v26, %v872_v25 }
 0x2e2   : > { %v876_v28 = vmul.f32 0.25, %v874_v27 }
 0x2e4   : > { %877 = vst [vmem:[%s267_s14] sm:$0xff] %v876_v28 }
 0x2e5   : > { %1467 = shalt.err (!%p1464_p6)
}
 0x2e6   : > { %s1468_s26 = scalar_lea.hbm %s1861_s13, 128  ;;  %s1472_s6 = scalar_lea.hbm %s1909_s4, 256 }
 0x2e7   : > { %p1469_p8 = scmp.ne.s32.totalorder %s1861_s13, %s1468_s26  ;;  %p1473_p4 = scmp.lt.u32.totalorder %s1861_s13, %s1909_s4 }
 0x2e8   : > { %p1474_p11 = scmp.lt.u32.totalorder %s1472_s6, %s1468_s26  ;;  %p1476_p3 = scmp.lt.u32.totalorder %s1468_s26, %s1861_s13 }
 0x2e9   : > { %p1470_p10 = pnand %p1469_p8, %p1655_p12 }
 0x2ea   : > { %p1475_p13 = por %p1474_p11, %p1473_p4 }
 0x2eb   : > { %p1471_p0 = pneg %p1470_p10 }
 0x2ec   : > { %p1477_p7 = por %p1476_p3, %p1475_p13 }
 0x2ee   : > { %p1478_p9 = pnand %p1477_p7, %p1471_p0 }
 0x2f0   : > { %1481 = shalt.err (!%p1478_p9)
}
 0x2f1   : > { %1306 = dma.vmem_to_hbm [thread:$0]  (%p1655_p12), %s1863_s29, 128, %s1861_s13, %s879_s5  }
 0x2f2 PF: > { %s904_s10 = sand.u32 1, %s1516_s15   ;;  %p1928_p1 = scmp.ne.s32.totalorder %s1916_s22, 0 }
 0x2f3   : > { %p1929_p5 = scmp.ge.s32.totalorder %s1528_s18, 2  ;;  %s905_s11 = scalar_lea.sflag [#allocation4], %s904_s10 }
 0x2f5   : > { %p1320_p2 = pnand %p1929_p5, %p1928_p1 }
 0x2f7   : > { %1511 = dma.done.wait (!%p1320_p2), %s905_s11, 128  }
 0x2f8   : > { %1513 = vsyncadd (!%p1320_p2), %s905_s11, 4294967168  ;;  %p20_p6 = scmp.ge.s32.totalorder %s1617_s27, 4   ;;  %s1930_s15 = smov %s1520_s16 }
 0x2f9   : > { %s1931_s16 = smov %s1524_s17  ;;  %s1932_s17 = smov %s1651_s24 }
 0x2fa   : > { %s1933_s18 = smov %s1617_s27  ;;  %22 = sbr.rel (!%p20_p6) target bundleno = 7 (0x7), region = 107 }
 0x301   :  { %910 = vsyncpa [#allocation3], 1 }
 0x302   :  { %912 = vsyncpa [#allocation3 + $0x1], 1 }
 0x303   :  { %913 = vsyncpa [#allocation6], 1 }
 0x304   :  { %915 = vsyncpa [#allocation6 + $0x1], 1 }
 0x305   :  { %916 = vsyncpa [#allocation4], 1 }
 0x306   :  { %918 = vsyncpa [#allocation4 + $0x1], 1 }

</bundles_post_ra>
